<compile_context>
chip_gen: v5e
topology: v5e:2x2
jax: 0.10.0
libtpu: 0.0.40
codegen_flags: <defaults>
</compile_context>

<pallas_src>
import jax
import jax.numpy as jnp
from jax import lax
from jax.experimental import pallas as pl
from jax.experimental.pallas import tpu as pltpu

KH = KW = 4
STRIDE = 2
NEG_SLOPE = 0.2
EPS = 1e-5
LANE = 128


def _leaky_relu(x):
    return jnp.where(x >= 0, x, NEG_SLOPE * x)


def down_block_kernel(xm_ref, xh_ref, w_ref, o_ref, sum_ref, ssq_ref):
    """Grid = (N, n_th); one (sample, row-tile) per step.

    xm_ref : (2, TH, Wout+1, 2*Cin)  parity-split, zero-padded, column-paired
    xh_ref : (2, 1,  Wout+1, 2*Cin)  one-row halo (row pair just below the tile)
    w_ref  : (KH, KW*Cin, Cp)        conv weight, row index = kw*Cin + cin
    o_ref  : (1, n_th, TH*Wout, Cp)  whole-sample block, resident across th
    sum_ref, ssq_ref : (1, Cp) f32   per-channel stats across row tiles
    """
    th = pl.program_id(1)
    _, TH, Wp1, C2 = xm_ref.shape
    _, n_th, THW, Cp = o_ref.shape
    Wout = Wp1 - 1
    HW = n_th * THW                      # total spatial size (static)

    # LeakyReLU hoisted: applied once per tile.  Zero padding is invariant
    # under LeakyReLU, so pad-then-activate == activate-then-pad.
    xm = _leaky_relu(xm_ref[...])        # (2, TH, Wp1, C2)
    xh = _leaky_relu(xh_ref[...])        # (2, 1,  Wp1, C2)
    w = w_ref[...]                       # (KH, 2*C2, Cp)

    acc = jnp.zeros((THW, Cp), jnp.float32)
    for parity in range(2):
        # Local padded rows of this parity, incl. the 1-row halo: contiguous.
        rows_all = jnp.concatenate([xm[parity], xh[parity]], axis=0)  # (TH+1, Wp1, C2)
        for q in range(2):
            kh = 2 * q + parity                      # conv kernel row
            rows = rows_all[q:q + TH]                # (TH, Wp1, C2) contiguous
            lo = rows[:, :Wout, :]                   # kw = 0, 1
            hi = rows[:, 1:, :]                      # kw = 2, 3
            if C2 % LANE == 0:
                # Fused K = 4*Cin contraction: fills the 256-deep v6e/v7x MXU,
                # halves matmul issues; lane-aligned concat is a clean copy.
                lhs = jnp.concatenate([lo, hi], axis=-1).reshape(THW, 2 * C2)
                acc = acc + jnp.dot(lhs, w[kh],
                                    preferred_element_type=jnp.float32)
            else:
                # Small Cin: avoid a sub-lane concat, keep two K=2*Cin dots.
                acc = acc + jnp.dot(lo.reshape(THW, C2), w[kh, :C2, :],
                                    preferred_element_type=jnp.float32)
                acc = acc + jnp.dot(hi.reshape(THW, C2), w[kh, C2:, :],
                                    preferred_element_type=jnp.float32)

    # Conv bias intentionally omitted: affine=False InstanceNorm's per-channel
    # mean subtraction cancels any per-channel constant exactly (variance
    # unchanged).  NOT valid for BatchNorm(eval)/Identity norms.

    # Single-pass statistics, accumulated across the row-tile axis.
    @pl.when(th == 0)
    def _init():
        sum_ref[...] = jnp.zeros_like(sum_ref)
        ssq_ref[...] = jnp.zeros_like(ssq_ref)

    sum_ref[...] += jnp.sum(acc, axis=0, keepdims=True)
    ssq_ref[...] += jnp.sum(acc * acc, axis=0, keepdims=True)

    # Stash this tile's raw conv output into the resident output block.
    o_ref[0, th] = acc.astype(o_ref.dtype)

    # Last row tile of this sample: stats complete -> normalize in place.
    @pl.when(th == n_th - 1)
    def _finalize():
        inv_hw = 1.0 / HW
        mean = sum_ref[...] * inv_hw                              # (1, Cp)
        var = jnp.maximum(ssq_ref[...] * inv_hw - mean * mean, 0.0)
        scale = lax.rsqrt(var + EPS)
        shift = -mean * scale
        y = o_ref[...].astype(jnp.float32)                        # (1, n_th, THW, Cp)
        o_ref[...] = (y * scale + shift).astype(o_ref.dtype)


def _round_up(x, m):
    return (x + m - 1) // m * m


def _pick_row_tile(Hout, Wout, Cin, itemsize, budget_bytes=4 << 20):
    """Largest divisor of Hout whose main input block fits the VMEM budget."""
    row_bytes = 2 * (Wout + 1) * 2 * Cin * itemsize
    if Hout * row_bytes <= budget_bytes:
        return Hout
    best = 1
    for d in range(1, Hout + 1):
        if Hout % d == 0 and d * row_bytes <= budget_bytes:
            best = d
    return best


def _vmem_limit_bytes():
    # ~44 MiB on v7x (64 MiB physical), ~90 MiB on v5e/v6e (128 MiB physical).
    try:
        cap = getattr(pltpu.get_tpu_info(), "vmem_capacity_bytes", None)
        if cap:
            return int(max(32 << 20, min(0.7 * cap, 100 << 20)))
    except Exception:
        pass
    return 48 << 20


def down_block_forward(x_nchw, weight, bias=None, *,
                       compute_dtype=jnp.bfloat16, row_tile=None):
    """x_nchw: (N, Cin, H, W); weight: (Cout, Cin, 4, 4); bias: (Cout,) -- the
    bias is mathematically cancelled by the affine=False InstanceNorm."""
    del bias
    N, Cin, H, W = x_nchw.shape
    Cout = weight.shape[0]
    assert H % 2 == 0 and W % 2 == 0, "stride-2 DownBlock expects even H, W"
    Hout, Wout = H // 2, W // 2
    out_dtype = x_nchw.dtype

    # Lane-dense output: pad Cout to a multiple of 128 (unmasked full-lane
    # stores); padded channels are exactly zero and sliced off below.
    Cp = Cout if Cout % LANE == 0 else _round_up(Cout, LANE)

    # NCHW -> NHWC, zero-pad H/W by 1, pair W columns (lane dim 2*Cin), and
    # pre-split H parity so per-kh row selection in the kernel is contiguous.
    # Reshapes are contiguous; the parity transpose is one cheap XLA relayout.
    x_nhwc = jnp.transpose(x_nchw, (0, 2, 3, 1))
    xp = jnp.pad(x_nhwc, ((0, 0), (1, 1), (1, 1), (0, 0)))
    xp = xp.reshape(N, Hout + 1, 2, Wout + 1, 2 * Cin)
    xp = jnp.transpose(xp, (0, 2, 1, 3, 4))
    xp = xp.reshape(N * 2, Hout + 1, Wout + 1, 2 * Cin).astype(compute_dtype)

    # (Cout, Cin, KH, KW) -> (KH, KW*Cin, Cp), row index = kw*Cin + cin.
    w3d = jnp.transpose(weight, (2, 3, 1, 0)).reshape(KH, KW * Cin, Cout)
    if Cp != Cout:
        w3d = jnp.pad(w3d, ((0, 0), (0, 0), (0, Cp - Cout)))
    w3d = w3d.astype(compute_dtype)

    if row_tile is None:
        row_tile = _pick_row_tile(Hout, Wout, Cin,
                                  jnp.dtype(compute_dtype).itemsize)
    assert 1 <= row_tile <= Hout and Hout % row_tile == 0, (Hout, row_tile)
    TH = row_tile
    n_th = Hout // TH
    THW = TH * Wout

    out = pl.pallas_call(
        down_block_kernel,
        out_shape=jax.ShapeDtypeStruct((N, n_th, THW, Cp), out_dtype),
        grid=(N, n_th),
        in_specs=[
            # Main rows of the tile (both parities): p in [th*TH, (th+1)*TH).
            pl.BlockSpec((2, TH, Wout + 1, 2 * Cin),
                         lambda n, th: (n, th, 0, 0)),
            # One-row halo: p = (th+1)*TH (block size 1 -> element index).
            pl.BlockSpec((2, 1, Wout + 1, 2 * Cin),
                         lambda n, th: (n, (th + 1) * TH, 0, 0)),
            pl.BlockSpec((KH, KW * Cin, Cp), lambda n, th: (0, 0, 0)),
        ],
        # Whole-sample output block stays resident across the row-tile axis;
        # normalized in place at the last tile, written back once per sample.
        out_specs=pl.BlockSpec((1, n_th, THW, Cp), lambda n, th: (n, 0, 0, 0)),
        scratch_shapes=[pltpu.VMEM((1, Cp), jnp.float32),
                        pltpu.VMEM((1, Cp), jnp.float32)],
        compiler_params=pltpu.CompilerParams(
            dimension_semantics=("parallel", "arbitrary"),
            vmem_limit_bytes=_vmem_limit_bytes(),
        ),
    )(xp, xp, w3d)

    out = out.reshape(N, Hout * Wout, Cp)[:, :, :Cout]
    out = out.reshape(N, Hout, Wout, Cout)
    return jnp.transpose(out, (0, 3, 1, 2))  # back to NCHW


def reference_forward(x_nchw, weight, bias):
    """Pure-JAX reference of the PyTorch forward (NCHW), including the bias."""
    x = jnp.where(x_nchw >= 0, x_nchw, NEG_SLOPE * x_nchw)
    y = lax.conv_general_dilated(
        x, weight, window_strides=(STRIDE, STRIDE),
        padding=((1, 1), (1, 1)),
        dimension_numbers=("NCHW", "OIHW", "NCHW"))
    y = y + bias.reshape(1, -1, 1, 1)
    mean = jnp.mean(y, axis=(2, 3), keepdims=True)
    var = jnp.mean((y - mean) ** 2, axis=(2, 3), keepdims=True)
    return (y - mean) * lax.rsqrt(var + EPS)


if __name__ == "__main__":
    key = jax.random.PRNGKey(0)

    # Shape A: small Cin (two-dot path, Cout padded 8->128).
    N, Cin, Cout, H, W = 2, 4, 8, 16, 16
    kx, kw_, kb, kx2, kw2, kb2 = jax.random.split(key, 6)
    x = jax.random.normal(kx, (N, Cin, H, W), dtype=jnp.float32)
    weight = 0.1 * jax.random.normal(kw_, (Cout, Cin, KH, KW), dtype=jnp.float32)
    bias = 0.1 * jax.random.normal(kb, (Cout,), dtype=jnp.float32)
    ref = reference_forward(x, weight, bias)

    # (A1) f32 operands, forced 2 row tiles: exact check of halo + cross-tile
    #      InstanceNorm accumulation.
    out_a1 = jax.block_until_ready(
        down_block_forward(x, weight, bias, compute_dtype=jnp.float32,
                           row_tile=4))
    assert out_a1.shape == (N, Cout, H // 2, W // 2), out_a1.shape
    err = float(jnp.max(jnp.abs(out_a1 - ref)))
    assert jnp.allclose(out_a1, ref, atol=5e-4, rtol=5e-4), err

    # (A2) bf16 operands (default perf path), auto row tile (single tile).
    out_a2 = jax.block_until_ready(down_block_forward(x, weight, bias))
    err = float(jnp.max(jnp.abs(out_a2 - ref)))
    assert jnp.allclose(out_a2, ref, atol=5e-2, rtol=5e-2), err

    # Shape B: Cin=64 (2*Cin lane-aligned -> fused K=4*Cin matmul path),
    # Cout already a lane multiple (no channel padding).
    N2, Cin2, Cout2, H2, W2 = 1, 64, 128, 8, 8
    x2 = jax.random.normal(kx2, (N2, Cin2, H2, W2), dtype=jnp.float32)
    weight2 = 0.1 * jax.random.normal(kw2, (Cout2, Cin2, KH, KW), dtype=jnp.float32)
    bias2 = 0.1 * jax.random.normal(kb2, (Cout2,), dtype=jnp.float32)
    ref2 = reference_forward(x2, weight2, bias2)
    out_b = jax.block_until_ready(down_block_forward(x2, weight2, bias2))
    assert out_b.shape == (N2, Cout2, H2 // 2, W2 // 2), out_b.shape
    err = float(jnp.max(jnp.abs(out_b - ref2)))
    assert jnp.allclose(out_b, ref2, atol=5e-2, rtol=5e-2), err

    print("KERNEL_OK")
</pallas_src>

<mosaic_0001>
module attributes {stable_mosaic.version = 11 : i64} {
  func.func @down_block_kernel(%arg0: i32, %arg1: i32, %arg2: memref<2x4x9x8xf32, #tpu.memory_space<vmem>>, %arg3: memref<2x1x9x8xf32, #tpu.memory_space<vmem>>, %arg4: memref<4x16x128xf32, #tpu.memory_space<vmem>>, %arg5: memref<1x2x32x128xf32, #tpu.memory_space<vmem>>, %arg6: memref<1x128xf32, #tpu.memory_space<vmem>>, %arg7: memref<1x128xf32, #tpu.memory_space<vmem>>) attributes {dimension_semantics = [#tpu.dimension_semantics<parallel>, #tpu.dimension_semantics<arbitrary>], iteration_bounds = array<i64: 2, 2>, scalar_prefetch = 0 : i64, scratch_operands = 2 : i64, tpu.core_type = #tpu.core_type<tc>, window_params = [{transform_indices = @transform_0, window_bounds = array<i64: 2, 4, 9, 8>}, {transform_indices = @transform_1, window_bounds = array<i64: 2, 1, 9, 8>}, {pipeline_mode = #tpu.pipeline_mode<synchronous>, transform_indices = @transform_2, window_bounds = array<i64: 4, 16, 128>}, {transform_indices = @transform_3, window_bounds = array<i64: 1, 2, 32, 128>}]} {
    %c0 = arith.constant 0 : index
    %c0_0 = arith.constant 0 : index
    %c0_1 = arith.constant 0 : index
    %c0_2 = arith.constant 0 : index
    %0 = vector.load %arg2[%c0, %c0_0, %c0_1, %c0_2] : memref<2x4x9x8xf32, #tpu.memory_space<vmem>>, vector<2x4x9x8xf32>
    %cst = arith.constant 0.000000e+00 : f32
    %1 = vector.broadcast %cst : f32 to vector<2x4x9x8xf32>
    %2 = arith.cmpf oge, %0, %1 : vector<2x4x9x8xf32>
    %cst_3 = arith.constant 2.000000e-01 : f32
    %3 = vector.broadcast %cst_3 : f32 to vector<2x4x9x8xf32>
    %4 = arith.mulf %3, %0 : vector<2x4x9x8xf32>
    %5 = arith.select %2, %0, %4 : vector<2x4x9x8xi1>, vector<2x4x9x8xf32>
    %c0_4 = arith.constant 0 : index
    %c0_5 = arith.constant 0 : index
    %c0_6 = arith.constant 0 : index
    %c0_7 = arith.constant 0 : index
    %6 = vector.load %arg3[%c0_4, %c0_5, %c0_6, %c0_7] : memref<2x1x9x8xf32, #tpu.memory_space<vmem>>, vector<2x1x9x8xf32>
    %cst_8 = arith.constant 0.000000e+00 : f32
    %7 = vector.broadcast %cst_8 : f32 to vector<2x1x9x8xf32>
    %8 = arith.cmpf oge, %6, %7 : vector<2x1x9x8xf32>
    %cst_9 = arith.constant 2.000000e-01 : f32
    %9 = vector.broadcast %cst_9 : f32 to vector<2x1x9x8xf32>
    %10 = arith.mulf %9, %6 : vector<2x1x9x8xf32>
    %11 = arith.select %8, %6, %10 : vector<2x1x9x8xi1>, vector<2x1x9x8xf32>
    %c0_10 = arith.constant 0 : index
    %c0_11 = arith.constant 0 : index
    %c0_12 = arith.constant 0 : index
    %12 = vector.load %arg4[%c0_10, %c0_11, %c0_12] : memref<4x16x128xf32, #tpu.memory_space<vmem>>, vector<4x16x128xf32>
    %cst_13 = arith.constant 0.000000e+00 : f32
    %13 = vector.broadcast %cst_13 : f32 to vector<32x128xf32>
    %14 = vector.extract_strided_slice %5 {offsets = [0, 0, 0, 0], sizes = [1, 4, 9, 8], strides = [1, 1, 1, 1]} : vector<2x4x9x8xf32> to vector<1x4x9x8xf32>
    %15 = vector.shape_cast %14 : vector<1x4x9x8xf32> to vector<4x9x8xf32>
    %16 = vector.extract_strided_slice %11 {offsets = [0, 0, 0, 0], sizes = [1, 1, 9, 8], strides = [1, 1, 1, 1]} : vector<2x1x9x8xf32> to vector<1x1x9x8xf32>
    %17 = vector.shape_cast %16 : vector<1x1x9x8xf32> to vector<1x9x8xf32>
    %18 = tpu.concatenate %15, %17 in 0 : vector<4x9x8xf32>, vector<1x9x8xf32> -> vector<5x9x8xf32>
    %19 = vector.extract_strided_slice %18 {offsets = [0, 0, 0], sizes = [4, 9, 8], strides = [1, 1, 1]} : vector<5x9x8xf32> to vector<4x9x8xf32>
    %20 = vector.extract_strided_slice %19 {offsets = [0, 0, 0], sizes = [4, 8, 8], strides = [1, 1, 1]} : vector<4x9x8xf32> to vector<4x8x8xf32>
    %21 = vector.extract_strided_slice %19 {offsets = [0, 1, 0], sizes = [4, 8, 8], strides = [1, 1, 1]} : vector<4x9x8xf32> to vector<4x8x8xf32>
    %22 = vector.shape_cast %20 : vector<4x8x8xf32> to vector<32x8xf32>
    %23 = vector.extract_strided_slice %12 {offsets = [0, 0, 0], sizes = [1, 8, 128], strides = [1, 1, 1]} : vector<4x16x128xf32> to vector<1x8x128xf32>
    %24 = vector.shape_cast %23 : vector<1x8x128xf32> to vector<8x128xf32>
    %cst_14 = arith.constant dense<0.000000e+00> : vector<32x128xf32>
    %25 = tpu.matmul %22, %24, %cst_14 {dimension_numbers = #tpu.dot_dimension_numbers<[1], [0], [0], [1], [0, 0, 1, 1], [], []>} : vector<32x8xf32>, vector<8x128xf32>, vector<32x128xf32> -> vector<32x128xf32>
    %26 = arith.addf %13, %25 : vector<32x128xf32>
    %27 = vector.shape_cast %21 : vector<4x8x8xf32> to vector<32x8xf32>
    %28 = vector.extract_strided_slice %12 {offsets = [0, 8, 0], sizes = [1, 8, 128], strides = [1, 1, 1]} : vector<4x16x128xf32> to vector<1x8x128xf32>
    %29 = vector.shape_cast %28 : vector<1x8x128xf32> to vector<8x128xf32>
    %cst_15 = arith.constant dense<0.000000e+00> : vector<32x128xf32>
    %30 = tpu.matmul %27, %29, %cst_15 {dimension_numbers = #tpu.dot_dimension_numbers<[1], [0], [0], [1], [0, 0, 1, 1], [], []>} : vector<32x8xf32>, vector<8x128xf32>, vector<32x128xf32> -> vector<32x128xf32>
    %31 = arith.addf %26, %30 : vector<32x128xf32>
    %32 = vector.extract_strided_slice %18 {offsets = [1, 0, 0], sizes = [4, 9, 8], strides = [1, 1, 1]} : vector<5x9x8xf32> to vector<4x9x8xf32>
    %33 = vector.extract_strided_slice %32 {offsets = [0, 0, 0], sizes = [4, 8, 8], strides = [1, 1, 1]} : vector<4x9x8xf32> to vector<4x8x8xf32>
    %34 = vector.extract_strided_slice %32 {offsets = [0, 1, 0], sizes = [4, 8, 8], strides = [1, 1, 1]} : vector<4x9x8xf32> to vector<4x8x8xf32>
    %35 = vector.shape_cast %33 : vector<4x8x8xf32> to vector<32x8xf32>
    %36 = vector.extract_strided_slice %12 {offsets = [2, 0, 0], sizes = [1, 8, 128], strides = [1, 1, 1]} : vector<4x16x128xf32> to vector<1x8x128xf32>
    %37 = vector.shape_cast %36 : vector<1x8x128xf32> to vector<8x128xf32>
    %cst_16 = arith.constant dense<0.000000e+00> : vector<32x128xf32>
    %38 = tpu.matmul %35, %37, %cst_16 {dimension_numbers = #tpu.dot_dimension_numbers<[1], [0], [0], [1], [0, 0, 1, 1], [], []>} : vector<32x8xf32>, vector<8x128xf32>, vector<32x128xf32> -> vector<32x128xf32>
    %39 = arith.addf %31, %38 : vector<32x128xf32>
    %40 = vector.shape_cast %34 : vector<4x8x8xf32> to vector<32x8xf32>
    %41 = vector.extract_strided_slice %12 {offsets = [2, 8, 0], sizes = [1, 8, 128], strides = [1, 1, 1]} : vector<4x16x128xf32> to vector<1x8x128xf32>
    %42 = vector.shape_cast %41 : vector<1x8x128xf32> to vector<8x128xf32>
    %cst_17 = arith.constant dense<0.000000e+00> : vector<32x128xf32>
    %43 = tpu.matmul %40, %42, %cst_17 {dimension_numbers = #tpu.dot_dimension_numbers<[1], [0], [0], [1], [0, 0, 1, 1], [], []>} : vector<32x8xf32>, vector<8x128xf32>, vector<32x128xf32> -> vector<32x128xf32>
    %44 = arith.addf %39, %43 : vector<32x128xf32>
    %45 = vector.extract_strided_slice %5 {offsets = [1, 0, 0, 0], sizes = [1, 4, 9, 8], strides = [1, 1, 1, 1]} : vector<2x4x9x8xf32> to vector<1x4x9x8xf32>
    %46 = vector.shape_cast %45 : vector<1x4x9x8xf32> to vector<4x9x8xf32>
    %47 = vector.extract_strided_slice %11 {offsets = [1, 0, 0, 0], sizes = [1, 1, 9, 8], strides = [1, 1, 1, 1]} : vector<2x1x9x8xf32> to vector<1x1x9x8xf32>
    %48 = vector.shape_cast %47 : vector<1x1x9x8xf32> to vector<1x9x8xf32>
    %49 = tpu.concatenate %46, %48 in 0 : vector<4x9x8xf32>, vector<1x9x8xf32> -> vector<5x9x8xf32>
    %50 = vector.extract_strided_slice %49 {offsets = [0, 0, 0], sizes = [4, 9, 8], strides = [1, 1, 1]} : vector<5x9x8xf32> to vector<4x9x8xf32>
    %51 = vector.extract_strided_slice %50 {offsets = [0, 0, 0], sizes = [4, 8, 8], strides = [1, 1, 1]} : vector<4x9x8xf32> to vector<4x8x8xf32>
    %52 = vector.extract_strided_slice %50 {offsets = [0, 1, 0], sizes = [4, 8, 8], strides = [1, 1, 1]} : vector<4x9x8xf32> to vector<4x8x8xf32>
    %53 = vector.shape_cast %51 : vector<4x8x8xf32> to vector<32x8xf32>
    %54 = vector.extract_strided_slice %12 {offsets = [1, 0, 0], sizes = [1, 8, 128], strides = [1, 1, 1]} : vector<4x16x128xf32> to vector<1x8x128xf32>
    %55 = vector.shape_cast %54 : vector<1x8x128xf32> to vector<8x128xf32>
    %cst_18 = arith.constant dense<0.000000e+00> : vector<32x128xf32>
    %56 = tpu.matmul %53, %55, %cst_18 {dimension_numbers = #tpu.dot_dimension_numbers<[1], [0], [0], [1], [0, 0, 1, 1], [], []>} : vector<32x8xf32>, vector<8x128xf32>, vector<32x128xf32> -> vector<32x128xf32>
    %57 = arith.addf %44, %56 : vector<32x128xf32>
    %58 = vector.shape_cast %52 : vector<4x8x8xf32> to vector<32x8xf32>
    %59 = vector.extract_strided_slice %12 {offsets = [1, 8, 0], sizes = [1, 8, 128], strides = [1, 1, 1]} : vector<4x16x128xf32> to vector<1x8x128xf32>
    %60 = vector.shape_cast %59 : vector<1x8x128xf32> to vector<8x128xf32>
    %cst_19 = arith.constant dense<0.000000e+00> : vector<32x128xf32>
    %61 = tpu.matmul %58, %60, %cst_19 {dimension_numbers = #tpu.dot_dimension_numbers<[1], [0], [0], [1], [0, 0, 1, 1], [], []>} : vector<32x8xf32>, vector<8x128xf32>, vector<32x128xf32> -> vector<32x128xf32>
    %62 = arith.addf %57, %61 : vector<32x128xf32>
    %63 = vector.extract_strided_slice %49 {offsets = [1, 0, 0], sizes = [4, 9, 8], strides = [1, 1, 1]} : vector<5x9x8xf32> to vector<4x9x8xf32>
    %64 = vector.extract_strided_slice %63 {offsets = [0, 0, 0], sizes = [4, 8, 8], strides = [1, 1, 1]} : vector<4x9x8xf32> to vector<4x8x8xf32>
    %65 = vector.extract_strided_slice %63 {offsets = [0, 1, 0], sizes = [4, 8, 8], strides = [1, 1, 1]} : vector<4x9x8xf32> to vector<4x8x8xf32>
    %66 = vector.shape_cast %64 : vector<4x8x8xf32> to vector<32x8xf32>
    %67 = vector.extract_strided_slice %12 {offsets = [3, 0, 0], sizes = [1, 8, 128], strides = [1, 1, 1]} : vector<4x16x128xf32> to vector<1x8x128xf32>
    %68 = vector.shape_cast %67 : vector<1x8x128xf32> to vector<8x128xf32>
    %cst_20 = arith.constant dense<0.000000e+00> : vector<32x128xf32>
    %69 = tpu.matmul %66, %68, %cst_20 {dimension_numbers = #tpu.dot_dimension_numbers<[1], [0], [0], [1], [0, 0, 1, 1], [], []>} : vector<32x8xf32>, vector<8x128xf32>, vector<32x128xf32> -> vector<32x128xf32>
    %70 = arith.addf %62, %69 : vector<32x128xf32>
    %71 = vector.shape_cast %65 : vector<4x8x8xf32> to vector<32x8xf32>
    %72 = vector.extract_strided_slice %12 {offsets = [3, 8, 0], sizes = [1, 8, 128], strides = [1, 1, 1]} : vector<4x16x128xf32> to vector<1x8x128xf32>
    %73 = vector.shape_cast %72 : vector<1x8x128xf32> to vector<8x128xf32>
    %cst_21 = arith.constant dense<0.000000e+00> : vector<32x128xf32>
    %74 = tpu.matmul %71, %73, %cst_21 {dimension_numbers = #tpu.dot_dimension_numbers<[1], [0], [0], [1], [0, 0, 1, 1], [], []>} : vector<32x8xf32>, vector<8x128xf32>, vector<32x128xf32> -> vector<32x128xf32>
    %75 = arith.addf %70, %74 : vector<32x128xf32>
    %c0_i32 = arith.constant 0 : i32
    %76 = arith.cmpi eq, %arg1, %c0_i32 : i32
    %77 = arith.extui %76 : i1 to i32
    %c0_i32_22 = arith.constant 0 : i32
    %78 = arith.cmpi ne, %77, %c0_i32_22 : i32
    scf.if %78 {
      %cst_37 = arith.constant 0.000000e+00 : f32
      %97 = vector.broadcast %cst_37 : f32 to vector<1x128xf32>
      %c0_38 = arith.constant 0 : index
      %c0_39 = arith.constant 0 : index
      %98 = vector.load %arg6[%c0_38, %c0_39] : memref<1x128xf32, #tpu.memory_space<vmem>>, vector<1x128xf32>
      tpu.vector_store %arg6[%c0_38, %c0_39], %97 {strides = array<i32>} : memref<1x128xf32, #tpu.memory_space<vmem>>, vector<1x128xf32>,
      %cst_40 = arith.constant 0.000000e+00 : f32
      %99 = vector.broadcast %cst_40 : f32 to vector<1x128xf32>
      %c0_41 = arith.constant 0 : index
      %c0_42 = arith.constant 0 : index
      %100 = vector.load %arg7[%c0_41, %c0_42] : memref<1x128xf32, #tpu.memory_space<vmem>>, vector<1x128xf32>
      tpu.vector_store %arg7[%c0_41, %c0_42], %99 {strides = array<i32>} : memref<1x128xf32, #tpu.memory_space<vmem>>, vector<1x128xf32>,
    } else {
    }
    %c0_23 = arith.constant 0 : index
    %c0_24 = arith.constant 0 : index
    %79 = vector.load %arg6[%c0_23, %c0_24] : memref<1x128xf32, #tpu.memory_space<vmem>>, vector<1x128xf32>
    %cst_25 = arith.constant dense<0.000000e+00> : vector<128xf32>
    %80 = vector.multi_reduction <add>, %75, %cst_25 [0] : vector<32x128xf32> to vector<128xf32>
    %81 = vector.shape_cast %80 : vector<128xf32> to vector<1x128xf32>
    %82 = arith.addf %79, %81 : vector<1x128xf32>
    %c0_26 = arith.constant 0 : index
    %c0_27 = arith.constant 0 : index
    %83 = vector.load %arg6[%c0_26, %c0_27] : memref<1x128xf32, #tpu.memory_space<vmem>>, vector<1x128xf32>
    tpu.vector_store %arg6[%c0_26, %c0_27], %82 {strides = array<i32>} : memref<1x128xf32, #tpu.memory_space<vmem>>, vector<1x128xf32>,
    %c0_28 = arith.constant 0 : index
    %c0_29 = arith.constant 0 : index
    %84 = vector.load %arg7[%c0_28, %c0_29] : memref<1x128xf32, #tpu.memory_space<vmem>>, vector<1x128xf32>
    %85 = arith.mulf %75, %75 : vector<32x128xf32>
    %cst_30 = arith.constant dense<0.000000e+00> : vector<128xf32>
    %86 = vector.multi_reduction <add>, %85, %cst_30 [0] : vector<32x128xf32> to vector<128xf32>
    %87 = vector.shape_cast %86 : vector<128xf32> to vector<1x128xf32>
    %88 = arith.addf %84, %87 : vector<1x128xf32>
    %c0_31 = arith.constant 0 : index
    %c0_32 = arith.constant 0 : index
    %89 = vector.load %arg7[%c0_31, %c0_32] : memref<1x128xf32, #tpu.memory_space<vmem>>, vector<1x128xf32>
    tpu.vector_store %arg7[%c0_31, %c0_32], %88 {strides = array<i32>} : memref<1x128xf32, #tpu.memory_space<vmem>>, vector<1x128xf32>,
    %c0_33 = arith.constant 0 : index
    %90 = arith.index_cast %arg1 : i32 to index
    %c0_34 = arith.constant 0 : index
    %c0_35 = arith.constant 0 : index
    %91 = vector.load %arg5[%c0_33, %90, %c0_34, %c0_35] : memref<1x2x32x128xf32, #tpu.memory_space<vmem>>, vector<1x1x32x128xf32>
    %92 = vector.shape_cast %91 : vector<1x1x32x128xf32> to vector<32x128xf32>
    %93 = vector.shape_cast %75 : vector<32x128xf32> to vector<1x1x32x128xf32>
    tpu.vector_store %arg5[%c0_33, %90, %c0_34, %c0_35], %93 {strides = array<i32>} : memref<1x2x32x128xf32, #tpu.memory_space<vmem>>, vector<1x1x32x128xf32>,
    %c1_i32 = arith.constant 1 : i32
    %94 = arith.cmpi eq, %arg1, %c1_i32 : i32
    %95 = arith.extui %94 : i1 to i32
    %c0_i32_36 = arith.constant 0 : i32
    %96 = arith.cmpi ne, %95, %c0_i32_36 : i32
    scf.if %96 {
      %c0_37 = arith.constant 0 : index
      %c0_38 = arith.constant 0 : index
      %97 = vector.load %arg6[%c0_37, %c0_38] : memref<1x128xf32, #tpu.memory_space<vmem>>, vector<1x128xf32>
      %cst_39 = arith.constant 1.562500e-02 : f32
      %98 = vector.broadcast %cst_39 : f32 to vector<1x128xf32>
      %99 = arith.mulf %97, %98 : vector<1x128xf32>
      %c0_40 = arith.constant 0 : index
      %c0_41 = arith.constant 0 : index
      %100 = vector.load %arg7[%c0_40, %c0_41] : memref<1x128xf32, #tpu.memory_space<vmem>>, vector<1x128xf32>
      %cst_42 = arith.constant 1.562500e-02 : f32
      %101 = vector.broadcast %cst_42 : f32 to vector<1x128xf32>
      %102 = arith.mulf %100, %101 : vector<1x128xf32>
      %103 = arith.mulf %99, %99 : vector<1x128xf32>
      %104 = arith.subf %102, %103 : vector<1x128xf32>
      %cst_43 = arith.constant 0.000000e+00 : f32
      %105 = vector.broadcast %cst_43 : f32 to vector<1x128xf32>
      %106 = arith.maximumf %104, %105 : vector<1x128xf32>
      %cst_44 = arith.constant 9.99999974E-6 : f32
      %107 = vector.broadcast %cst_44 : f32 to vector<1x128xf32>
      %108 = arith.addf %106, %107 : vector<1x128xf32>
      %109 = math.rsqrt %108 : vector<1x128xf32>
      %cst_45 = arith.constant 0.000000e+00 : f32
      %110 = vector.broadcast %cst_45 : f32 to vector<1x128xf32>
      %111 = arith.subf %110, %99 : vector<1x128xf32>
      %112 = arith.mulf %111, %109 : vector<1x128xf32>
      %c0_46 = arith.constant 0 : index
      %c0_47 = arith.constant 0 : index
      %c0_48 = arith.constant 0 : index
      %c0_49 = arith.constant 0 : index
      %113 = vector.load %arg5[%c0_46, %c0_47, %c0_48, %c0_49] : memref<1x2x32x128xf32, #tpu.memory_space<vmem>>, vector<1x2x32x128xf32>
      %114 = vector.shape_cast %109 : vector<1x128xf32> to vector<1x1x1x128xf32>
      %115 = vector.broadcast %114 : vector<1x1x1x128xf32> to vector<1x2x32x128xf32>
      %116 = arith.mulf %113, %115 : vector<1x2x32x128xf32>
      %117 = vector.shape_cast %112 : vector<1x128xf32> to vector<1x1x1x128xf32>
      %118 = vector.broadcast %117 : vector<1x1x1x128xf32> to vector<1x2x32x128xf32>
      %119 = arith.addf %116, %118 : vector<1x2x32x128xf32>
      %c0_50 = arith.constant 0 : index
      %c0_51 = arith.constant 0 : index
      %c0_52 = arith.constant 0 : index
      %c0_53 = arith.constant 0 : index
      %120 = vector.load %arg5[%c0_50, %c0_51, %c0_52, %c0_53] : memref<1x2x32x128xf32, #tpu.memory_space<vmem>>, vector<1x2x32x128xf32>
      tpu.vector_store %arg5[%c0_50, %c0_51, %c0_52, %c0_53], %119 {strides = array<i32>} : memref<1x2x32x128xf32, #tpu.memory_space<vmem>>, vector<1x2x32x128xf32>,
    } else {
    }
    return
  }
  func.func @transform_0(%arg0: i32, %arg1: i32) -> (i32, i32, i32, i32) {
    %c0_i32 = arith.constant 0 : i32
    %c0_i32_0 = arith.constant 0 : i32
    %c0_i32_1 = arith.constant 0 : i32
    return %arg0, %arg1, %c0_i32, %c0_i32_0 : i32, i32, i32, i32
  }
  func.func @transform_1(%arg0: i32, %arg1: i32) -> (i32, i32, i32, i32) {
    %c1_i32 = arith.constant 1 : i32
    %0 = arith.addi %arg1, %c1_i32 : i32
    %c4_i32 = arith.constant 4 : i32
    %1 = arith.muli %0, %c4_i32 : i32
    %c0_i32 = arith.constant 0 : i32
    %c0_i32_0 = arith.constant 0 : i32
    %c0_i32_1 = arith.constant 0 : i32
    return %arg0, %1, %c0_i32, %c0_i32_0 : i32, i32, i32, i32
  }
  func.func @transform_2(%arg0: i32, %arg1: i32) -> (i32, i32, i32) {
    %c0_i32 = arith.constant 0 : i32
    %c0_i32_0 = arith.constant 0 : i32
    %c0_i32_1 = arith.constant 0 : i32
    %c0_i32_2 = arith.constant 0 : i32
    return %c0_i32, %c0_i32_0, %c0_i32_1 : i32, i32, i32
  }
  func.func @transform_3(%arg0: i32, %arg1: i32) -> (i32, i32, i32, i32) {
    %c0_i32 = arith.constant 0 : i32
    %c0_i32_0 = arith.constant 0 : i32
    %c0_i32_1 = arith.constant 0 : i32
    %c0_i32_2 = arith.constant 0 : i32
    return %arg0, %c0_i32, %c0_i32_0, %c0_i32_1 : i32, i32, i32, i32
  }
}

</mosaic_0001>

<bundles_post_ra>
// kernel: tpu_custom_call.1
= control target key start
LH: loop header
LB: loop body
LE: loop exit
PB: predicated region body
PF: predicated region fallthrough
CT: control target
= control target key end

     0   :  { %s2013_s0 = inlined_call_operand.vmem [shape: f32[4,9,9,8], index: 0, kind: input, shape index: {}]   ;;  %s2014_s1 = inlined_call_operand.vmem [shape: f32[4,9,9,8], index: 1, kind: input, shape index: {}]   ;;  %s2015_s2 = inlined_call_operand.vmem [shape: f32[4,16,128], index: 2, kind: input, shape index: {}]   ;;  %s2016_s3 = inlined_call_operand.hbm [shape: f32[2,2,32,128], index: 3, kind: output, shape index: {}]  }
   0x1   :  { %2022 = sst [smem:[#allocation16_spill]] %s2013_s0 }
   0x2   :  { %2023 = sst [smem:[#allocation17_spill]] %s2016_s3 }
   0x3   :  { %8 = vsyncpa [#allocation7], 0 }
   0x4   :  { %10 = vsyncpa [#allocation7 + $0x1], 0  ;;  %s1623_s12 = smov 0   ;;  %s1625_s13 = smov 0  }
   0x5   :  { %s1627_s14 = smov 0   ;;  %s1629_s15 = smov 0  }
   0x6   :  { %s1631_s16 = smov 0   ;;  %s1633_s17 = smov 0  }
   0x7   :  { %s1635_s18 = smov 0   ;;  %s1637_s19 = smov 0  }
   0x8   :  { %s1639_s20 = smov 0   ;;  %s1641_s21 = smov 0  }
   0x9   :  { %s1643_s22 = smov 0   ;;  %s1645_s23 = smov 0  }
   0xa LB: > { %2024 = sst [smem:[#allocation9_spill]] %s1546_s14  ;;  %s25_s26 = sadd.s32 1, %s1574_s21  ;;  %s1582_s23 = sphi %s1645_s23, %s16_s23   ;;  %s1578_s22 = sphi %s1643_s22, %s2058_s22   ;;  %s1574_s21 = sphi %s1641_s21, %s2057_s21   ;;  %s1570_s20 = sphi %s1639_s20, %s2056_s20   ;;  %s1566_s19 = sphi %s1637_s19, %s2055_s19   ;;  %s1562_s18 = sphi %s1635_s18, %s2048_s18   ;;  %s1558_s17 = sphi %s1633_s17, %s2047_s17   ;;  %s1554_s16 = sphi %s1631_s16, %s2054_s16   ;;  %s1550_s15 = sphi %s1629_s15, %s2053_s15   ;;  %s1546_s14 = sphi %s1627_s14, %s2045_s14   ;;  %s1542_s13 = sphi %s1625_s13, %s2052_s13   ;;  %s1538_s12 = sphi %s1623_s12, %s2051_s12  }
   0xb   : > { %2025 = sst [smem:[#allocation10_spill]] %s1562_s18  ;;  %s28_s27 = sadd.s32 1, %s1578_s22 }
   0xc   : > { %p26_p0 = scmp.ge.s32.totalorder %s25_s26, 2  ;;  %s37_s28 = sadd.s32 1, %s1562_s18 }
   0xd   : > { %p44_p1 = scmp.ne.s32.totalorder %s1562_s18, %s1558_s17  ;;  %p45_p2 = scmp.eq.s32.totalorder %s1582_s23, 0 }
   0xe   : > { %s2060_s26 = smov (%p26_p0, %s25_s26), 0  ;;  %s2062_s27 = smov (!%p26_p0, %s28_s27), %s1578_s22 }
   0xf   : > { %2026 = sst [smem:[#allocation11_spill]] %s2060_s26  ;;  %s33_s29 = ssub.s32 %s1574_s21, %s2060_s26 }
  0x10   : > { %p1698_p3 = por %p45_p2, %p44_p1  ;;  %p30_p4 = scmp.ge.s32.totalorder %s2062_s27, 2 }
  0x11   : > { %s1237_s4 = sshll.u32 %s1574_s21, 2  ;;  %s1239_s6 = sshll.u32 %s2060_s26, 2 }
  0x12   : > { %s1238_s5 = sadd.s32 4, %s1237_s4  ;;  %s2064_s27 = smov (%p30_p4, %s2062_s27), 0 }
  0x13   : > { %2028 = sst [smem:[#allocation12_spill]] %s2064_s27  ;;  %s1240_s7 = sadd.s32 4, %s1239_s6 }
  0x14   : > { %s69_s8 = sadd.s32 1, %s1554_s16  ;;  %s32_s9 = ssub.s32 %s1578_s22, %s2064_s27 }
  0x15   : > { %s65_s10 = ssub.s32 %s1238_s5, %s1240_s7  ;;  %s34_s11 = sor.u32 %s33_s29, %s32_s9 }
  0x16   : > { %s66_s25 = sor.u32 %s65_s10, %s32_s9  ;;  %p35_p5 = scmp.eq.s32.totalorder %s34_s11, 0 }
  0x17   : > { %p67_p6 = scmp.eq.s32.totalorder %s66_s25, 0  ;;  %p76_p7 = scmp.ne.s32.totalorder %s1554_s16, %s1550_s15 }
  0x18   : > { %p114_p8 = scmp.eq.s32.totalorder %s32_s9, 0  ;;  %s116_s26 = sadd.s32 1, %s1546_s14 }
  0x19   : > { %s1712_s4 = scalar_select %p35_p5, %s1562_s18, %s37_s28  }
  0x1a   : > { %s1715_s24 = scalar_select %p67_p6, %s1554_s16, %s69_s8  }
  0x1b   : > { %2029 = sst [smem:[#allocation13_spill]] %s1712_s4  ;;  %p1719_p9 = por %p76_p7, %p45_p2 }
  0x1c   : > { %2030 = sst [smem:[#allocation14_spill]] %s1715_s24  ;;  %p126_p10 = scmp.ne.s32.totalorder %s1546_s14, %s1542_s13 }
  0x1d   : > { %s1725_s3 = scalar_select %p114_p8, %s1546_s14, %s116_s26  }
  0x1e   : > { %s2033_s5 = sadd.s32 4294967295, %s1582_s23   ;;  %p132_p12 = scmp.ne.s32.totalorder %s1542_s13, %s1538_s12 }
  0x1f   : > { %2032 = sst [smem:[#allocation15_spill]] %s1725_s3  ;;  %p127_p11 = scmp.eq.s32.totalorder %s2033_s5, 3 }
  0x20   : > { %s2034_s29 = sadd.s32 4294967294, %s1582_s23   ;;  %p1165_p2 = scmp.ge.s32.totalorder %s1582_s23, 4 }
  0x21   : > { %p133_p13 = scmp.eq.s32.totalorder %s2034_s29, 3  ;;  %p1735_p0 = por %p127_p11, %p126_p10 }
  0x22   : > { %152 = sbr.rel (%p1165_p2) target bundleno = 78 (0x4e), region = 20 }
  0x23   : > { %p1739_p1 = por %p133_p13, %p132_p12 }
  0x27   : > { %155 = sbr.rel (!%p1698_p3) target bundleno = 66 (0x42), region = 24  ;;  %s157_s26 = sand.u32 (%p1698_p3), 1, %s1562_s18  }
  0x28   : > { %s1747_s7 = sshll.u32 (%p1698_p3), %s157_s26, 7  ;;  %s1242_s8 = sshll.u32 (%p1698_p3), %s1574_s21, 3 }
  0x29   : > { %s1246_s9 = smul.u32 (%p1698_p3), 36, %s1578_s22  ;;  %s2037_s0 = sld [smem:[#allocation16_spill]] (%p1698_p3) }
  0x2a   : > { %s159_s4 = scalar_lea.vmem (%p1698_p3), [#allocation4], %s1747_s7   ;;  %s1764_s26 = smov (%p1698_p3), 0  }
  0x2b   : > { %s170_s10 = sadd.s32 (%p1698_p3), %s1246_s9, %s1242_s8  ;;  %s2038_s30 = smov (%p1698_p3), %s159_s4 }
  0x2c   : > { %s1174_s11 = sshll.u32 %s170_s10, 3  ;;  %s1766_s24 = smov 0  }
  0x2f   : > { %s1754_s27 = scalar_lea.vmem %s2037_s0, %s1174_s11  }
  0x30   : > { %s2039_s18 = smov %s1754_s27 }
  0x31 LB: >> { %v271_v0 = vld [vmem:[%s1590_s18] sm:$0xff]  ;;  %v273_v1 = vld [vmem:[%s1590_s18 + $0x8] sm:$0xff]  ;;  %v275_v2 = vld [vmem:[%s1590_s18 + $0x10] sm:$0xff]  ;;  %s303_s8 = sadd.s32 1, %s1594_s26  ;;  %s265_s24 = sadd.s32 1, %s1598_s24   ;;  %s1598_s24 = sphi %s1766_s24, %s265_s24   ;;  %s1594_s26 = sphi %s1764_s26, %s2042_s26   ;;  %s1590_s18 = sphi %s2039_s18, %s2041_s18   ;;  %s1586_s30 = sphi %s2038_s30, %s2040_s30  }
  0x32   : >> { %272 = vst [vmem:[%s1586_s30] sm:$0xff] %v271_v0  ;;  %v277_v3 = vld [vmem:[%s1590_s18 + $0x18] sm:$0xff]  ;;  %p304_p3 = scmp.ge.s32.totalorder %s303_s8, 1  ;;  %v279_v4 = vld [vmem:[%s1590_s18 + $0x20] sm:$0xff]  ;;  %v281_v5 = vld [vmem:[%s1590_s18 + $0x28] sm:$0xff]  ;;  %p264_p4 = scmp.ge.s32.totalorder %s265_s24, 1 }
  0x33   : >> { %274 = vst [vmem:[%s1586_s30 + $0x8] sm:$0xff] %v273_v1  ;;  %v283_v6 = vld [vmem:[%s1590_s18 + $0x30] sm:$0xff]  ;;  %v285_v7 = vld [vmem:[%s1590_s18 + $0x38] sm:$0xff]  ;;  %v291_v10 = vld [vmem:[%s1590_s18 + $0xa0] sm:$0xff] }
  0x34   : >> { %276 = vst [vmem:[%s1586_s30 + $0x10] sm:$0xff] %v275_v2  ;;  %s2066_s8 = smov (%p304_p3, %s303_s8), 0  ;;  %v287_v8 = vld [vmem:[%s1590_s18 + $0x90] sm:$0xff]  ;;  %v289_v9 = vld [vmem:[%s1590_s18 + $0x98] sm:$0xff]  ;;  %v293_v11 = vld [vmem:[%s1590_s18 + $0xa8] sm:$0xff] }
  0x35   : >> { %278 = vst [vmem:[%s1586_s30 + $0x18] sm:$0xff] %v277_v3  ;;  %s1178_s9 = sshll.u32 %s2066_s8, 6  ;;  %v295_v12 = vld [vmem:[%s1590_s18 + $0xb0] sm:$0xff]  ;;  %v297_v13 = vld [vmem:[%s1590_s18 + $0xb8] sm:$0xff]  ;;  %v299_v14 = vld [vmem:[%s1590_s18 + $0xc0] sm:$0xff]  ;;  %s2042_s26 = smov %s2066_s8 }
  0x36   : >> { %280 = vst [vmem:[%s1586_s30 + $0x20] sm:$0xff] %v279_v4  ;;  %s308_s10 = scalar_lea.vmem %s1754_s27, %s1178_s9   ;;  %s309_s11 = scalar_lea.vmem %s159_s4, %s1178_s9 [#allocation4]   ;;  %v301_v15 = vld [vmem:[%s1590_s18 + $0xc8] sm:$0xff] }
  0x37   : >> { %282 = vst [vmem:[%s1586_s30 + $0x28] sm:$0xff] %v281_v5  ;;  %s2041_s18 = smov %s308_s10 }
  0x38   : >> { %284 = vst [vmem:[%s1586_s30 + $0x30] sm:$0xff] %v283_v6 }
  0x39   : >> { %286 = vst [vmem:[%s1586_s30 + $0x38] sm:$0xff] %v285_v7 }
  0x3a   : >> { %288 = vst [vmem:[%s1586_s30 + $0x40] sm:$0xff] %v287_v8 }
  0x3b   : >> { %290 = vst [vmem:[%s1586_s30 + $0x48] sm:$0xff] %v289_v9 }
  0x3c   : >> { %292 = vst [vmem:[%s1586_s30 + $0x50] sm:$0xff] %v291_v10 }
  0x3d   : >> { %294 = vst [vmem:[%s1586_s30 + $0x58] sm:$0xff] %v293_v11  ;;  %267 = sbr.rel (!%p264_p4) target bundleno = 49 (0x31), region = 187 }
  0x3e   : >> { %296 = vst [vmem:[%s1586_s30 + $0x60] sm:$0xff] %v295_v12 }
  0x3f   : >> { %298 = vst [vmem:[%s1586_s30 + $0x68] sm:$0xff] %v297_v13 }
  0x40   : >> { %300 = vst [vmem:[%s1586_s30 + $0x70] sm:$0xff] %v299_v14 }
  0x41   : >> { %302 = vst [vmem:[%s1586_s30 + $0x78] sm:$0xff] %v301_v15  ;;  %s2040_s30 = smov %s309_s11 }
  0x42 PF: > { %342 = sbr.rel (!%p1719_p9) target bundleno = 78 (0x4e), region = 76  ;;  %s344_s5 = sand.u32 (%p1719_p9), 1, %s1554_s16  }
  0x43   : > { %s1187_s29 = sshll.u32 (%p1719_p9), %s1574_s21, 3  ;;  %s1186_s9 = sshll.u32 (%p1719_p9), %s344_s5, 5 }
  0x44   : > { %s1064_s0 = smul.u32 (%p1719_p9), 36, %s1578_s22  ;;  %s346_s18 = scalar_lea.vmem (%p1719_p9), [#allocation5], %s1186_s9 }
  0x46   : > { %s1065_s3 = sadd.s32 (%p1719_p9), %s1187_s29, %s1064_s0 }
  0x47   : > { %s1188_s11 = sshll.u32 %s1065_s3, 3 }
  0x48   : > { %s1067_s8 = scalar_lea.vmem %s2014_s1, %s1188_s11 }
  0x49   : > { %v1189_v16 = vld [vmem:[%s1067_s8 + $0x40] sm:$0xff]  ;;  %v1190_v17 = vld [vmem:[%s1067_s8 + $0x48] sm:$0xff]  ;;  %v1191_v18 = vld [vmem:[%s1067_s8 + $0xd0] sm:$0xff] }
  0x4a   : > { %390 = vst [vmem:[%s346_s18] sm:$0xff] %v1189_v16  ;;  %v1192_v19 = vld [vmem:[%s1067_s8 + $0xd8] sm:$0xff] }
  0x4b   : > { %392 = vst [vmem:[%s346_s18 + $0x8] sm:$0xff] %v1190_v17 }
  0x4c   : > { %394 = vst [vmem:[%s346_s18 + $0x10] sm:$0xff] %v1191_v18 }
  0x4d   : > { %396 = vst [vmem:[%s346_s18 + $0x18] sm:$0xff] %v1192_v19 }
  0x4e PF: > { %p1193_p5 = scmp.ge.s32.totalorder %s1582_s23, 1  ;;  %p401_p6 = scmp.lt.s32.totalorder %s1582_s23, 5 }
  0x50   : > { %p402_p7 = pnand %p1193_p5, %p401_p6 }
  0x51   : > { %s408_s14 = sand.u32 (!%p402_p7), 1, %s1558_s17   ;;  %s439_s4 = sand.u32 (!%p402_p7), 1, %s1542_s13  }
  0x52   : > { %405 = sbr.rel (%p402_p7) target bundleno = 381 (0x17d), region = 114  ;;  %s1194_s30 = sshll.u32 (!%p402_p7), %s408_s14, 7 }
  0x53   : > { %s1849_s26 = sshll.u32 (!%p402_p7), %s439_s4, 6  ;;  %s1866_s14 = scalar_lea.vmem (!%p402_p7), [#allocation4], %s1194_s30 }
  0x54   : > { %s415_s24 = sand.u32 (!%p402_p7), 1, %s1550_s15   ;;  %s1934_s6 = scalar_lea.vmem (!%p402_p7), [#allocation6], %s1849_s26 }
  0x55   : > { %s1195_s27 = sshll.u32 (!%p402_p7), %s415_s24, 5  ;;  %p1229_p8 = scmp.ne.s32.totalorder (!%p402_p7), %s1566_s19, 0 }
  0x56   : > { %s1887_s15 = scalar_lea.vmem (!%p402_p7), [#allocation5], %s1195_s27 }
  0x57   : > { %v536_v20 = vld [vmem:[%s2015_s2 + $0x20] sm:$0xff]  ;;  %v538_v21 = vld [vmem:[%s2015_s2 + $0x30] sm:$0xff]  ;;  %v533_v22 = vld [vmem:[%s2015_s2 + $0x8] sm:$0xff]  ;;  %vm561_vm0 = vcmask 64512   ;;  %vm548_vm1 = vcmask 1046528  }
  0x58   : > { %654 = vmatpush.msra.mxu2 %v536_v20  ;;  %585 = vmatpush.msra.mxu0 %v533_v22  ;;  %v532_v23 = vld [vmem:[%s2015_s2] sm:$0xff]  ;;  %v537_v24 = vld [vmem:[%s2015_s2 + $0x28] sm:$0xff]  ;;  %v534_v25 = vld [vmem:[%s2015_s2 + $0x10] sm:$0xff] }
  0x59   : > { %622 = vmatpush.msra.mxu1 %v532_v23  ;;  %v539_v26 = vld [vmem:[%s2015_s2 + $0x38] sm:$0xff]  ;;  %693 = vmatpush.msra.mxu3 %v537_v24  ;;  %v452_v29 = vld [vmem:[%s1866_s14] sm:$0xff]  ;;  %v453_v30 = vld [vmem:[%s1866_s14 + $0x8] sm:$0x1] }
  0x5a   : > { %831 = vmatpush.msrb.mxu2 %v538_v21  ;;  %v535_v27 = vld [vmem:[%s2015_s2 + $0x18] sm:$0xff]  ;;  %738 = vmatpush.msrb.mxu0 %v534_v25  ;;  %vm468_vm3 = vcmp.ge.f32.partialorder %v452_v29, 0.0  ;;  %vm469_vm4 = vcmp.ge.f32.partialorder %v453_v30, 0.0  ;;  %v456_v32 = vld [vmem:[%s1866_s14 + $0x20] sm:$0xff]  ;;  %v484_v33 = vmul.f32 0.2, %v452_v29 }
  0x5b   : > { %v454_v28 = vld [vmem:[%s1866_s14 + $0x10] sm:$0xff]  ;;  %870 = vmatpush.msrb.mxu3 %v539_v26  ;;  %795 = vmatpush.msrb.mxu1 %v535_v27  ;;  %v485_v34 = vmul.f32 0.2, %v453_v30  ;;  %v455_v35 = vld [vmem:[%s1866_s14 + $0x18] sm:$0x1]  ;;  %vm472_vm6 = vcmp.ge.f32.partialorder %v456_v32, 0.0 }
  0x5c   : > { %vm470_vm2 = vcmp.ge.f32.partialorder %v454_v28, 0.0  ;;  %v486_v31 = vmul.f32 0.2, %v454_v28  ;;  %vm471_vm5 = vcmp.ge.f32.partialorder %v455_v35, 0.0  ;;  %v487_v37 = vmul.f32 0.2, %v455_v35 }
  0x5d   : > { %v457_v38 = vld [vmem:[%s1866_s14 + $0x28] sm:$0x1]  ;;  %v500_v40 = vsel %vm468_vm3, %v452_v29, %v484_v33  ;;  %v501_v41 = vsel %vm469_vm4, %v453_v30, %v485_v34  ;;  %v488_v42 = vmul.f32 0.2, %v456_v32  ;;  %v458_v52 = vld [vmem:[%s1866_s14 + $0x30] sm:$0xff]  ;;  %v516_v61 = vld [vmem:[%s1887_s15] sm:$0xff] }
  0x5e   : > { %v502_v36 = vsel %vm470_vm2, %v454_v28, %v486_v31  ;;  %v549_v43 = vrot.slane %v500_v40, 1  ;;  %v550_v44 = vrot.slane %v501_v41, 1  ;;  %1201 = vmatmul.msk.f32.vlgmr.msra.gmra.mxu1 %vm561_vm0, %v500_v40  ;;  %v503_v45 = vsel %vm471_vm5, %v455_v35, %v487_v37  ;;  %v459_v53 = vld [vmem:[%s1866_s14 + $0x38] sm:$0x1]  ;;  %v517_v62 = vld [vmem:[%s1887_s15 + $0x8] sm:$0x1] }
  0x5f   : > { %v552_v39 = vrot.slane %v502_v36, 1  ;;  %1205 = vmatmul.msk.f32.vlgmr.msra.gmra.mxu2 %vm561_vm0, %v502_v36  ;;  %vm473_vm7 = vcmp.ge.f32.partialorder %v457_v38, 0.0  ;;  %v553_v46 = vrot.slane %v503_v45, 1  ;;  %v489_v47 = vmul.f32 0.2, %v457_v38  ;;  %v460_v3 = vld [vmem:[%s1866_s14 + $0x40] sm:$0xff] }
  0x60   : > { %v551_v48 = vsel %vm548_vm1, %v549_v43, %v550_v44  ;;  %v504_v49 = vsel %vm472_vm6, %v456_v32, %v488_v42  ;;  %v490_v56 = vmul.f32 0.2, %v458_v52  ;;  %v491_v57 = vmul.f32 0.2, %v459_v53  ;;  %v461_v4 = vld [vmem:[%s1866_s14 + $0x48] sm:$0x1] }
  0x61   : > { %1197 = vmatmul.msk.f32.vlgmr.msra.gmra.mxu0 %vm561_vm0, %v551_v48  ;;  %v554_v50 = vsel %vm548_vm1, %v552_v39, %v553_v46  ;;  %v505_v51 = vsel %vm473_vm7, %v457_v38, %v489_v47  ;;  %v555_v54 = vrot.slane %v504_v49, 1  ;;  %vm474_vm8 = vcmp.ge.f32.partialorder %v458_v52, 0.0  ;;  %v462_v10 = vld [vmem:[%s1866_s14 + $0x50] sm:$0xff]  ;;  %v463_v11 = vld [vmem:[%s1866_s14 + $0x58] sm:$0x1]  ;;  %v464_v23 = vld [vmem:[%s1866_s14 + $0x60] sm:$0xff] }
  0x62   : > { %1209 = vmatmul.msk.f32.vlgmr.msra.gmra.mxu3 %vm561_vm0, %v554_v50  ;;  %v556_v55 = vrot.slane %v505_v51, 1  ;;  %vm475_vm9 = vcmp.ge.f32.partialorder %v459_v53, 0.0  ;;  %v506_v59 = vsel %vm474_vm8, %v458_v52, %v490_v56  ;;  %v524_v1 = vmul.f32 0.2, %v516_v61  ;;  %v465_v24 = vld [vmem:[%s1866_s14 + $0x68] sm:$0x1] }
  0x63   : > { %v507_v60 = vsel %vm475_vm9, %v459_v53, %v491_v57  ;;  %v558_v63 = vrot.slane %v506_v59, 1  ;;  %v525_v2 = vmul.f32 0.2, %v517_v62  ;;  %vm520_vm10 = vcmp.ge.f32.partialorder %v516_v61, 0.0  ;;  %v466_v33 = vld [vmem:[%s1866_s14 + $0x70] sm:$0xff] }
  0x64   : > { %v557_v58 = vsel %vm548_vm1, %v555_v54, %v556_v55  ;;  %v559_v0 = vrot.slane %v507_v60, 1  ;;  %vm521_vm11 = vcmp.ge.f32.partialorder %v517_v62, 0.0  ;;  %v528_v6 = vsel %vm520_vm10, %v516_v61, %v524_v1  ;;  %v467_v34 = vld [vmem:[%s1866_s14 + $0x78] sm:$0x1]  ;;  %v518_v42 = vld [vmem:[%s1887_s15 + $0x10] sm:$0xff] }
  0x65   : > { %v529_v7 = vsel %vm521_vm11, %v517_v62, %v525_v2  ;;  %v492_v8 = vmul.f32 0.2, %v460_v3  ;;  %v493_v9 = vmul.f32 0.2, %v461_v4  ;;  %vm476_vm12 = vcmp.ge.f32.partialorder %v460_v3, 0.0 }
  0x66   : > { %1202 = vmatmul.msk.f32.gmra.mxu1 %vm561_vm0, %v502_v36  ;;  %v560_v5 = vsel %vm548_vm1, %v558_v63, %v559_v0  ;;  %vm477_vm13 = vcmp.ge.f32.partialorder %v461_v4, 0.0  ;;  %v673_v12 = vrot.slane %v528_v6, 1  ;;  %v674_v13 = vrot.slane %v529_v7, 1  ;;  %v519_v43 = vld [vmem:[%s1887_s15 + $0x18] sm:$0x1] }
  0x67   : > { %1206 = vmatmul.msk.f32.gmra.mxu2 %vm561_vm0, %v504_v49  ;;  %v494_v14 = vmul.f32 0.2, %v462_v10  ;;  %v508_v15 = vsel %vm476_vm12, %v460_v3, %v492_v8  ;;  %v495_v16 = vmul.f32 0.2, %v463_v11  ;;  %v509_v17 = vsel %vm477_vm13, %v461_v4, %v493_v9 }
  0x68   : > { %vm478_vm14 = vcmp.ge.f32.partialorder %v462_v10, 0.0  ;;  %vm479_vm15 = vcmp.ge.f32.partialorder %v463_v11, 0.0  ;;  %v675_v18 = vsel %vm548_vm1, %v673_v12, %v674_v13  ;;  %v760_v19 = vrot.slane %v508_v15, 1 }
  0x69   : > { %1198 = vmatmul.msk.f32.gmra.mxu0 %vm561_vm0, %v554_v50  ;;  %v761_v20 = vrot.slane %v509_v17, 1  ;;  %v510_v21 = vsel %vm478_vm14, %v462_v10, %v494_v14  ;;  %v511_v22 = vsel %vm479_vm15, %v463_v11, %v495_v16  ;;  %v496_v28 = vmul.f32 0.2, %v464_v23 }
  0x6a   : > { %1210 = vmatmul.msk.f32.gmra.mxu3 %vm561_vm0, %v557_v58  ;;  %v763_v25 = vrot.slane %v510_v21, 1  ;;  %v764_v26 = vrot.slane %v511_v22, 1  ;;  %v497_v29 = vmul.f32 0.2, %v465_v24  ;;  %vm480_vm2 = vcmp.ge.f32.partialorder %v464_v23, 0.0 }
  0x6b   : > { %v762_v27 = vsel %vm548_vm1, %v760_v19, %v761_v20  ;;  %vm481_vm3 = vcmp.ge.f32.partialorder %v465_v24, 0.0  ;;  %v512_v31 = vsel %vm480_vm2, %v464_v23, %v496_v28  ;;  %v498_v37 = vmul.f32 0.2, %v466_v33 }
  0x6c   : > { %v765_v30 = vsel %vm548_vm1, %v763_v25, %v764_v26  ;;  %v513_v32 = vsel %vm481_vm3, %v465_v24, %v497_v29  ;;  %v766_v35 = vrot.slane %v512_v31, 1  ;;  %v499_v38 = vmul.f32 0.2, %v467_v34 }
  0x6d   : > { %v767_v36 = vrot.slane %v513_v32, 1  ;;  %vm482_vm4 = vcmp.ge.f32.partialorder %v466_v33, 0.0  ;;  %vm483_vm5 = vcmp.ge.f32.partialorder %v467_v34, 0.0  ;;  %v526_v46 = vmul.f32 0.2, %v518_v42 }
  0x6e   : > { %1203 = vmatmul.msk.f32.gmra.mxu1 %vm561_vm0, %v504_v49  ;;  %v514_v40 = vsel %vm482_vm4, %v466_v33, %v498_v37  ;;  %v515_v41 = vsel %vm483_vm5, %v467_v34, %v499_v38  ;;  %v527_v47 = vmul.f32 0.2, %v519_v43  ;;  %vm522_vm6 = vcmp.ge.f32.partialorder %v518_v42, 0.0 }
  0x6f   : > { %1207 = vmatmul.msk.f32.gmra.mxu2 %vm561_vm0, %v506_v59  ;;  %v768_v39 = vsel %vm548_vm1, %v766_v35, %v767_v36  ;;  %v769_v44 = vrot.slane %v514_v40, 1  ;;  %v770_v45 = vrot.slane %v515_v41, 1  ;;  %vm523_vm7 = vcmp.ge.f32.partialorder %v519_v43, 0.0 }
  0x70   : > { %v530_v49 = vsel %vm522_vm6, %v518_v42, %v526_v46  ;;  %v531_v50 = vsel %vm523_vm7, %v519_v43, %v527_v47 }
  0x71   : > { %1199 = vmatmul.msk.f32.gmra.mxu0 %vm561_vm0, %v557_v58  ;;  %v771_v48 = vsel %vm548_vm1, %v769_v44, %v770_v45  ;;  %v850_v51 = vrot.slane %v530_v49, 1  ;;  %v851_v52 = vrot.slane %v531_v50, 1 }
  0x72   : > { %1211 = vmatmul.msk.f32.gmra.mxu3 %vm561_vm0, %v560_v5 }
  0x73   : > { %v852_v53 = vsel %vm548_vm1, %v850_v51, %v851_v52 }
  0x76   : > { %1204 = vmatmul.msk.f32.gmra.mxu1 %vm561_vm0, %v506_v59 }
  0x77   : > { %1208 = vmatmul.msk.f32.gmra.mxu2 %vm561_vm0, %v528_v6 }
  0x79   : > { %1200 = vmatmul.msk.f32.gmra.mxu0 %vm561_vm0, %v560_v5 }
  0x7a   : > { %1212 = vmatmul.msk.f32.gmra.mxu3 %vm561_vm0, %v675_v18 }
  0x7e   : > { %1217 = vmatmul.msk.f32.vlgmr.msrb.gmra.mxu1 %vm561_vm0, %v762_v27 }
  0x7f   : > { %1221 = vmatmul.msk.f32.vlgmr.msrb.gmra.mxu2 %vm561_vm0, %v510_v21 }
  0x81   : > { %1213 = vmatmul.msk.f32.vlgmr.msrb.gmra.mxu0 %vm561_vm0, %v508_v15 }
  0x82   : > { %1225 = vmatmul.msk.f32.vlgmr.msrb.gmra.mxu3 %vm561_vm0, %v765_v30 }
  0x86   : > { %1218 = vmatmul.msk.f32.gmra.mxu1 %vm561_vm0, %v765_v30 }
  0x87   : > { %1222 = vmatmul.msk.f32.gmra.mxu2 %vm561_vm0, %v512_v31 }
  0x89   : > { %1214 = vmatmul.msk.f32.gmra.mxu0 %vm561_vm0, %v510_v21 }
  0x8a   : > { %1226 = vmatmul.msk.f32.gmra.mxu3 %vm561_vm0, %v768_v39 }
  0x8e   : > { %1219 = vmatmul.msk.f32.gmra.mxu1 %vm561_vm0, %v768_v39 }
  0x8f   : > { %1223 = vmatmul.msk.f32.gmra.mxu2 %vm561_vm0, %v514_v40 }
  0x91   : > { %1215 = vmatmul.msk.f32.gmra.mxu0 %vm561_vm0, %v512_v31 }
  0x92   : > { %1227 = vmatmul.msk.f32.gmra.mxu3 %vm561_vm0, %v771_v48 }
  0x96   : > { %1220 = vmatmul.msk.f32.gmra.mxu1 %vm561_vm0, %v771_v48 }
  0x97   : > { %1224 = vmatmul.msk.f32.gmra.mxu2 %vm561_vm0, %v530_v49 }
  0x99   : > { %1216 = vmatmul.msk.f32.gmra.mxu0 %vm561_vm0, %v514_v40 }
  0x9a   : > { %1228 = vmatmul.msk.f32.gmra.mxu3 %vm561_vm0, %v852_v53 }
  0xdb   : > { %v624_v54 = vpop.f32.mrf.mxu1 }
  0xde   : > { %v587_v55 = vpop.f32.mrf.mxu0 }
  0xdf   : > { %v625_v2 = vadd.f32 %v624_v54, %v587_v55 }
  0xe2   : > { %v656_v56 = vpop.f32.mrf.mxu2 }
  0xe3   : > { %v627_v57 = vpop.f32.mrf.mxu1  ;;  %v668_v6 = vadd.f32 %v656_v56, %v625_v2 }
  0xe5   : > { %v695_v58 = vpop.f32.mrf.mxu3 }
  0xe6   : > { %v590_v59 = vpop.f32.mrf.mxu0  ;;  %v707_v8 = vadd.f32 %v695_v58, %v668_v6 }
  0xe7   : > { %v628_v9 = vadd.f32 %v627_v57, %v590_v59 }
  0xea   : > { %v659_v60 = vpop.f32.mrf.mxu2 }
  0xeb   : > { %v630_v61 = vpop.f32.mrf.mxu1  ;;  %v669_v14 = vadd.f32 %v659_v60, %v628_v9 }
  0xed   : > { %v698_v62 = vpop.f32.mrf.mxu3 }
  0xee   : > { %v593_v63 = vpop.f32.mrf.mxu0  ;;  %v708_v18 = vadd.f32 %v698_v62, %v669_v14 }
  0xef   : > { %v631_v19 = vadd.f32 %v630_v61, %v593_v63 }
  0xf2   : > { %v662_v0 = vpop.f32.mrf.mxu2 }
  0xf3   : > { %v633_v1 = vpop.f32.mrf.mxu1  ;;  %v670_v25 = vadd.f32 %v662_v0, %v631_v19 }
  0xf5   : > { %v701_v3 = vpop.f32.mrf.mxu3 }
  0xf6   : > { %v596_v4 = vpop.f32.mrf.mxu0  ;;  %v709_v29 = vadd.f32 %v701_v3, %v670_v25 }
  0xf7   : > { %v634_v30 = vadd.f32 %v633_v1, %v596_v4 }
  0xfa   : > { %v665_v5 = vpop.f32.mrf.mxu2 }
  0xfb   : > { %v797_v7 = vpop.f32.mrf.mxu1  ;;  %v671_v36 = vadd.f32 %v665_v5, %v634_v30 }
  0xfd   : > { %v704_v10 = vpop.f32.mrf.mxu3 }
  0xfe   : > { %v740_v11 = vpop.f32.mrf.mxu0  ;;  %v710_v39 = vadd.f32 %v704_v10, %v671_v36 }
  0xff   : > { %v752_v12 = vadd.f32 %v740_v11, %v707_v8 }
 0x101   : > { %v809_v15 = vadd.f32 %v797_v7, %v752_v12 }
 0x102   : > { %v833_v13 = vpop.f32.mrf.mxu2 }
 0x103   : > { %v845_v16 = vadd.f32 %v833_v13, %v809_v15  ;;  %v800_v17 = vpop.f32.mrf.mxu1 }
 0x105   : > { %v872_v20 = vpop.f32.mrf.mxu3 }
 0x106   : > { %v884_v21 = vadd.f32 %v872_v20, %v845_v16  ;;  %v743_v22 = vpop.f32.mrf.mxu0 }
 0x107   : > { %v753_v23 = vadd.f32 %v743_v22, %v708_v18 }
 0x109   : > { %v810_v26 = vadd.f32 %v800_v17, %v753_v23 }
 0x10a   : > { %v836_v24 = vpop.f32.mrf.mxu2 }
 0x10b   : > { %v846_v27 = vadd.f32 %v836_v24, %v810_v26  ;;  %v803_v28 = vpop.f32.mrf.mxu1 }
 0x10d   : > { %v875_v31 = vpop.f32.mrf.mxu3 }
 0x10e   : > { %v885_v32 = vadd.f32 %v875_v31, %v846_v27  ;;  %v746_v33 = vpop.f32.mrf.mxu0 }
 0x10f   : > { %v754_v34 = vadd.f32 %v746_v33, %v709_v29 }
 0x111   : > { %v811_v37 = vadd.f32 %v803_v28, %v754_v34 }
 0x112   : > { %v839_v35 = vpop.f32.mrf.mxu2 }
 0x113   : > { %v847_v38 = vadd.f32 %v839_v35, %v811_v37  ;;  %v806_v43 = vpop.f32.mrf.mxu1 }
 0x115   : > { %v878_v40 = vpop.f32.mrf.mxu3 }
 0x116   : > { %v886_v41 = vadd.f32 %v878_v40, %v847_v38  ;;  %v749_v42 = vpop.f32.mrf.mxu0 }
 0x117   : > { %v755_v44 = vadd.f32 %v749_v42, %v710_v39 }
 0x119   : > { %v812_v46 = vadd.f32 %v806_v43, %v755_v44 }
 0x11a   : > { %v842_v45 = vpop.f32.mrf.mxu2  ;;  %891 = sbr.rel (%p1229_p8) target bundleno = 290 (0x122), region = 126 }
 0x11b   : > { %v848_v47 = vadd.f32 %v842_v45, %v812_v46 }
 0x11d   : > { %v881_v48 = vpop.f32.mrf.mxu3 }
 0x11e   : > { %v887_v49 = vadd.f32 %v881_v48, %v848_v47 }
 0x11f   : > { %v1600_v50 = vmov 0.0  }
 0x120   : > { %892 = vst [vmem:[#allocation2] sm:$0x1] %v1600_v50 }
 0x121   : > { %893 = vst [vmem:[#allocation3] sm:$0x1] %v1600_v50 }
 0x122 PF: > { %v895_v51 = vadd.f32 %v885_v32, %v884_v21  ;;  %v907_v52 = vmul.f32 %v884_v21, %v884_v21  ;;  %v908_v53 = vmul.f32 %v885_v32, %v885_v32  ;;  %v909_v54 = vmul.f32 %v886_v41, %v886_v41  ;;  %s1230_s7 = sshll.u32 %s1566_s19, 5  ;;  %p1231_p9 = scmp.ne.s32.totalorder %s1566_s19, 1 }
 0x123   : > { %s923_s30 = scalar_lea.vmem %s1934_s6, %s1230_s7 [#allocation6]  ;;  %v910_v56 = vmul.f32 %v887_v49, %v887_v49 }
 0x124   : > { %v896_v55 = vadd.f32 %v895_v51, %v886_v41  ;;  %v911_v57 = vadd.f32 %v908_v53, %v907_v52  ;;  %924 = vst [vmem:[%s923_s30] sm:$0xff] %v884_v21 }
 0x125   : > { %925 = vst [vmem:[%s923_s30 + $0x8] sm:$0xff] %v885_v32 }
 0x126   : > { %v897_v58 = vadd.f32 %v896_v55, %v887_v49  ;;  %v912_v59 = vadd.f32 %v911_v57, %v909_v54  ;;  %926 = vst [vmem:[%s923_s30 + $0x10] sm:$0xff] %v886_v41 }
 0x127   : > { %927 = vst [vmem:[%s923_s30 + $0x18] sm:$0xff] %v887_v49  ;;  %v894_v6 = vld [vmem:[#allocation2] sm:$0x1] }
 0x128   : > { %v898_v60 = vrot.slane %v897_v58, 4  ;;  %v913_v61 = vadd.f32 %v912_v59, %v910_v56  ;;  %v906_v9 = vld [vmem:[#allocation3] sm:$0x1] }
 0x12a   : > { %v899_v62 = vadd.f32 %v898_v60, %v897_v58  ;;  %v914_v63 = vrot.slane %v913_v61, 4 }
 0x12c   : > { %v900_v0 = vrot.slane %v899_v62, 2  ;;  %v915_v1 = vadd.f32 %v914_v63, %v913_v61 }
 0x12e   : > { %v901_v2 = vadd.f32 %v900_v0, %v899_v62  ;;  %v916_v3 = vrot.slane %v915_v1, 2 }
 0x130   : > { %v902_v4 = vrot.slane %v901_v2, 1  ;;  %v917_v5 = vadd.f32 %v916_v3, %v915_v1 }
 0x132   : > { %v903_v7 = vadd.f32 %v902_v4, %v901_v2  ;;  %v918_v8 = vrot.slane %v917_v5, 1 }
 0x134   : > { %v904_v10 = vadd.f32 %v903_v7, %v894_v6  ;;  %v919_v11 = vadd.f32 %v918_v8, %v917_v5  ;;  %931 = sbr.rel (%p1231_p9) target bundleno = 360 (0x168), region = 130 }
 0x136   : > { %905 = vst [vmem:[#allocation2] sm:$0x1] %v904_v10  ;;  %v920_v12 = vadd.f32 %v919_v11, %v906_v9 }
 0x138   : > { %921 = vst [vmem:[#allocation3] sm:$0x1] %v920_v12 }
 0x139   : > { %v952_v29 = vld [vmem:[%s1934_s6] sm:$0xff]  ;;  %v953_v30 = vld [vmem:[%s1934_s6 + $0x8] sm:$0xff]  ;;  %v954_v31 = vld [vmem:[%s1934_s6 + $0x10] sm:$0xff] }
 0x13a   : > { %v955_v34 = vld [vmem:[%s1934_s6 + $0x18] sm:$0xff]  ;;  %v956_v35 = vld [vmem:[%s1934_s6 + $0x20] sm:$0xff]  ;;  %v957_v36 = vld [vmem:[%s1934_s6 + $0x28] sm:$0xff] }
 0x13b   : > { %v958_v37 = vld [vmem:[%s1934_s6 + $0x30] sm:$0xff]  ;;  %v959_v42 = vld [vmem:[%s1934_s6 + $0x38] sm:$0xff] }
 0x13d   : > { %v932_v13 = vld [vmem:[#allocation2] sm:$0x1] }
 0x13e   : > { %v933_v15 = vmul.f32 0.015625, %v932_v13 }
 0x13f   : > { %v934_v14 = vld [vmem:[#allocation3] sm:$0x1] }
 0x140   : > { %v935_v16 = vmul.f32 0.015625, %v934_v14  ;;  %v936_v17 = vmul.f32 %v933_v15, %v933_v15  ;;  %v950_v26 = vsub.f32 0.0, %v933_v15 }
 0x142   : > { %v937_v18 = vsub.f32 %v935_v16, %v936_v17 }
 0x144   : > { %v938_v19 = vmax.f32 %v937_v18, 0.0 }
 0x146   : > { %v939_v20 = vadd.f32 1e-05, %v938_v19 }
 0x148   : > { %1417 = vrsqrt.f32 %v939_v20  ;;  %vm946_vm0 = vweird.f32 %v939_v20 }
 0x14e   : > { %v1418_v21 = vpop.eup %1417 }
 0x14f   : > { %v941_v22 = vmul.f32 %v1418_v21, %v939_v20  ;;  %vm947_vm1 = vweird.f32 %v1418_v21 }
 0x150   : > { %vm948_vm8 = vmor %vm946_vm0, %vm947_vm1 }
 0x151   : > { %v942_v23 = vmul.f32 %v1418_v21, %v941_v22 }
 0x153   : > { %v943_v24 = vmul.f32 0.5, %v942_v23 }
 0x155   : > { %v944_v25 = vsub.f32 1.5, %v943_v24 }
 0x157   : > { %v945_v27 = vmul.f32 %v1418_v21, %v944_v25 }
 0x159   : > { %v949_v28 = vsel %vm948_vm8, %v1418_v21, %v945_v27 }
 0x15a   : > { %v951_v32 = vmul.f32 %v950_v26, %v949_v28  ;;  %v961_v33 = vperm.slane %v949_v28, 0 }
 0x15c   : > { %v963_v38 = vmul.f32 %v961_v33, %v952_v29  ;;  %v972_v39 = vperm.slane %v951_v32, 0  ;;  %v964_v40 = vmul.f32 %v961_v33, %v953_v30  ;;  %v965_v41 = vmul.f32 %v961_v33, %v954_v31 }
 0x15d   : > { %v966_v43 = vmul.f32 %v961_v33, %v955_v34  ;;  %v967_v44 = vmul.f32 %v961_v33, %v956_v35  ;;  %v968_v45 = vmul.f32 %v961_v33, %v957_v36  ;;  %v969_v49 = vmul.f32 %v961_v33, %v958_v37 }
 0x15e   : > { %v974_v46 = vadd.f32 %v972_v39, %v963_v38  ;;  %v975_v47 = vadd.f32 %v972_v39, %v964_v40  ;;  %v976_v48 = vadd.f32 %v972_v39, %v965_v41  ;;  %v970_v51 = vmul.f32 %v961_v33, %v959_v42 }
 0x15f   : > { %v977_v50 = vadd.f32 %v972_v39, %v966_v43  ;;  %v978_v52 = vadd.f32 %v972_v39, %v967_v44  ;;  %v979_v53 = vadd.f32 %v972_v39, %v968_v45  ;;  %v980_v54 = vadd.f32 %v972_v39, %v969_v49 }
 0x160   : > { %982 = vst [vmem:[%s1934_s6] sm:$0xff] %v974_v46  ;;  %v981_v55 = vadd.f32 %v972_v39, %v970_v51 }
 0x161   : > { %983 = vst [vmem:[%s1934_s6 + $0x8] sm:$0xff] %v975_v47 }
 0x162   : > { %984 = vst [vmem:[%s1934_s6 + $0x10] sm:$0xff] %v976_v48 }
 0x163   : > { %985 = vst [vmem:[%s1934_s6 + $0x18] sm:$0xff] %v977_v50 }
 0x164   : > { %986 = vst [vmem:[%s1934_s6 + $0x20] sm:$0xff] %v978_v52 }
 0x165   : > { %987 = vst [vmem:[%s1934_s6 + $0x28] sm:$0xff] %v979_v53 }
 0x166   : > { %988 = vst [vmem:[%s1934_s6 + $0x30] sm:$0xff] %v980_v54 }
 0x167   : > { %989 = vst [vmem:[%s1934_s6 + $0x38] sm:$0xff] %v981_v55 }
 0x168 PF: > { %s1245_s19 = sshll.u32 %s1570_s20, 6  ;;  %s2043_s29 = sld [smem:[#allocation17_spill]] }
 0x169   : > { %s1003_s9 = sshll.u32 %s1934_s6, 4  ;;  %s991_s10 = scalar_lea.sflag [#allocation7], %s439_s4  ;;  %s1004_s9 = int_to_ptr.vmem [resolvable:$true] %s1003_s9 }
 0x16e   : > { %s1002_s17 = scalar_lea.hbm %s2043_s29, %s1245_s19  ;;  %s1439_s20 = scalar_lea.hbm %s2043_s29, 128 }
 0x16f   : > { %s1005_s11 = sshll.u32 %s1002_s17, 4  ;;  %s1006_s11 = int_to_ptr.hbm [resolvable:$true] %s1005_s11 }
 0x170   : > { %s1433_s8 = sshra.s32 %s1006_s11, 4  ;;  %s1434_s8 = int_to_ptr.hbm [resolvable:$true] %s1433_s8 }
 0x171   : > { %s1435_s18 = scalar_lea.hbm %s1434_s8, 64  ;;  %p1440_p13 = scmp.lt.s32.totalorder %s1434_s8, %s2043_s29 }
 0x172   : > { %p1436_p10 = scmp.ne.s32.totalorder %s1434_s8, %s1435_s18  ;;  %p1441_p2 = scmp.lt.s32.totalorder %s1439_s20, %s1435_s18 }
 0x174   : > { %p1437_p11 = pnand %p1436_p10, %p1735_p0  ;;  %p1442_p3 = por %p1441_p2, %p1440_p13 }
 0x176   : > { %p1438_p12 = pneg %p1437_p11 }
 0x178   : > { %p1443_p4 = pnand %p1442_p3, %p1438_p12 }
 0x17a   : > { %1446 = shalt.err (!%p1443_p4)
}
 0x17b   : > { %s1601_s4 = smov 128   ;;  %s1602_s27 = smov 8  }
 0x17c   : > { %1247 = dma.vmem_to_hbm [thread:$0]  (%p1735_p0), %s1004_s9, 1024, %s1006_s11, %s991_s10, %s1601_s4, %s1601_s4, %s1602_s27  }
 0x17d PF: > { %p1253_p5 = scmp.ge.s32.totalorder %s1582_s23, 2  ;;  %s1020_s15 = sand.u32 1, %s1538_s12  }
 0x17e   : > { %s1021_s6 = scalar_lea.sflag [#allocation7], %s1020_s15 }
 0x17f   : > { %p1250_p6 = pnand %p1253_p5, %p1739_p1 }
 0x181   : > { %p1251_p7 = pneg %p1250_p6 }
 0x183   : > { %1529 = dma.done.wait (%p1251_p7), %s1021_s6, 1024  }
 0x184   : > { %1531 = vsyncadd (%p1251_p7), %s1021_s6, 4294966272  ;;  %s16_s23 = sadd.s32 1, %s1582_s23   ;;  %s2044_s7 = sld [smem:[#allocation9_spill]] }
 0x185   : > { %p13_p8 = scmp.ge.s32.totalorder %s16_s23, 6   ;;  %s2045_s14 = sld [smem:[#allocation15_spill]] }
 0x186   : > { %s2046_s25 = sld [smem:[#allocation14_spill]]  ;;  %s2051_s12 = smov %s1542_s13 }
 0x187   : > { %s2047_s17 = sld [smem:[#allocation10_spill]]  ;;  %s2053_s15 = smov %s1554_s16 }
 0x188   : > { %s2048_s18 = sld [smem:[#allocation13_spill]]  ;;  %s2055_s19 = smov %s1574_s21 }
 0x189   : > { %s2049_s30 = sld [smem:[#allocation11_spill]]  ;;  %s2056_s20 = smov %s1578_s22 }
 0x18a   : > { %s2050_s26 = sld [smem:[#allocation12_spill]]  ;;  %s2052_s13 = smov %s2044_s7 }
 0x18c   : > { %s2054_s16 = smov %s2046_s25  ;;  %15 = sbr.rel (!%p13_p8) target bundleno = 10 (0xa), region = 209 }
 0x18f   : > { %s2057_s21 = smov %s2049_s30 }
 0x190   : > { %s2058_s22 = smov %s2050_s26 }
 0x191   :  { %1027 = vsyncpa [#allocation7], 1 }
 0x192   :  { %1029 = vsyncpa [#allocation7 + $0x1], 1 }

</bundles_post_ra>
